<compile_context>
chip_gen: v5e
topology: v5e:2x2
jax: 0.10.0
libtpu: 0.0.40
codegen_flags: <defaults>
</compile_context>

<pallas_src>
import jax
import jax.numpy as jnp
from jax.experimental import pallas as pl
from jax.experimental.pallas import tpu as pltpu


SCALE = 2.0            # the fixed lambda: x -> x * 2.0
_LANES = 1024          # lane-dense last dim (multiple of 128)
_MAX_TILE_ROWS = 512   # 512 x 1024 f32 = 2 MiB per tile (safe on all generations)


def lambda_kernel(x_ref, o_ref):
    # Elementwise lambda applied on the current VMEM tile.
    o_ref[...] = x_ref[...] * SCALE


def lambda_layer(x: jax.Array) -> jax.Array:
    """Applies lambd(x) = x * 2.0 via a tiled, pipelined Pallas TPU kernel."""
    orig_shape = x.shape
    total = x.size

    # Flatten to a lane-dense 2-D slab (rows, _LANES), independent of the
    # original geometry.  Pad (rarely needed) so the last axis is exactly
    # _LANES wide; the padding is sliced away afterwards.
    flat = x.reshape(-1)
    padded = pl.cdiv(total, _LANES) * _LANES
    if padded != total:
        flat = jnp.pad(flat, (0, padded - total))
    rows = padded // _LANES
    x2d = flat.reshape(rows, _LANES)

    # Row-tile size: 512 rows (multiple of 8 sublanes) for streaming, or the
    # full row count for tiny inputs (block equal to full dim is always legal).
    tm = _MAX_TILE_ROWS if rows >= _MAX_TILE_ROWS else rows
    grid = (pl.cdiv(rows, tm),)

    out2d = pl.pallas_call(
        lambda_kernel,
        out_shape=jax.ShapeDtypeStruct((rows, _LANES), x.dtype),
        grid=grid,
        in_specs=[pl.BlockSpec((tm, _LANES), lambda i: (i, 0))],
        out_specs=pl.BlockSpec((tm, _LANES), lambda i: (i, 0)),
        compiler_params=pltpu.CompilerParams(
            dimension_semantics=("parallel",),
        ),
    )(x2d)

    out = out2d.reshape(-1)
    if padded != total:
        out = out[:total]
    return out.reshape(orig_shape)


if __name__ == "__main__":
    key = jax.random.PRNGKey(0)

    # Small NCHW input consistent with a conv-style VAE feature map.
    x = jax.random.normal(key, (2, 4, 16, 16), dtype=jnp.float32)
    y = jax.block_until_ready(lambda_layer(x))
    y_ref = x * SCALE
    assert y.shape == x.shape and y.dtype == x.dtype
    assert jnp.allclose(y, y_ref, atol=1e-6, rtol=1e-6)

    # Extra robustness check: a shape whose flat size is NOT a multiple of
    # the lane width, exercising the pad/slice path.
    x2 = jax.random.normal(jax.random.PRNGKey(1), (3, 5, 7, 11), dtype=jnp.float32)
    y2 = jax.block_until_ready(lambda_layer(x2))
    assert jnp.allclose(y2, x2 * SCALE, atol=1e-6, rtol=1e-6)

    print("KERNEL_OK")
</pallas_src>

<mosaic_0001>
module attributes {stable_mosaic.version = 11 : i64} {
  func.func @lambda_kernel(%arg0: i32, %arg1: memref<2x1024xf32, #tpu.memory_space<vmem>>, %arg2: memref<2x1024xf32, #tpu.memory_space<vmem>>) attributes {dimension_semantics = [#tpu.dimension_semantics<parallel>], iteration_bounds = array<i64: 1>, scalar_prefetch = 0 : i64, scratch_operands = 0 : i64, tpu.core_type = #tpu.core_type<tc>, window_params = [{transform_indices = @transform_0, window_bounds = array<i64: 2, 1024>}, {transform_indices = @transform_1, window_bounds = array<i64: 2, 1024>}]} {
    %c0 = arith.constant 0 : index
    %c0_0 = arith.constant 0 : index
    %0 = vector.load %arg1[%c0, %c0_0] : memref<2x1024xf32, #tpu.memory_space<vmem>>, vector<2x1024xf32>
    %cst = arith.constant 2.000000e+00 : f32
    %1 = vector.broadcast %cst : f32 to vector<2x1024xf32>
    %2 = arith.mulf %0, %1 : vector<2x1024xf32>
    %c0_1 = arith.constant 0 : index
    %c0_2 = arith.constant 0 : index
    %3 = vector.load %arg2[%c0_1, %c0_2] : memref<2x1024xf32, #tpu.memory_space<vmem>>, vector<2x1024xf32>
    tpu.vector_store %arg2[%c0_1, %c0_2], %2 {strides = array<i32>} : memref<2x1024xf32, #tpu.memory_space<vmem>>, vector<2x1024xf32>,
    return
  }
  func.func @transform_0(%arg0: i32) -> (i32, i32) {
    %c0_i32 = arith.constant 0 : i32
    %c0_i32_0 = arith.constant 0 : i32
    return %arg0, %c0_i32 : i32, i32
  }
  func.func @transform_1(%arg0: i32) -> (i32, i32) {
    %c0_i32 = arith.constant 0 : i32
    %c0_i32_0 = arith.constant 0 : i32
    return %arg0, %c0_i32 : i32, i32
  }
}

</mosaic_0001>

<bundles_post_ra>
// kernel: tpu_custom_call.1
= control target key start
LH: loop header
LB: loop body
LE: loop exit
PB: predicated region body
PF: predicated region fallthrough
CT: control target
= control target key end

     0   :  { %6 = vsyncpa [#allocation3], 0  ;;  %s118_s0 = inlined_call_operand.hbm [shape: f32[2,1024], index: 0, kind: input, shape index: {}]   ;;  %s119_s1 = inlined_call_operand.hbm [shape: f32[2,1024], index: 1, kind: output, shape index: {}]  }
   0x1   :  { %7 = vsyncpa [#allocation4], 0  ;;  %s13_s8 = sshll.u32 %s118_s0, 4  ;;  %s100_s9 = smov [#allocation2]   ;;  %s14_s8 = int_to_ptr.hbm [resolvable:$true] %s13_s8 }
   0x2   :  { %s15_s10 = sshll.u32 %s100_s9, 4  ;;  %s16_s10 = int_to_ptr.vmem [resolvable:$true] %s15_s10 }
   0x3   :  { %18 = dma.hbm_to_vmem [thread:$0]  %s14_s8, 256, %s16_s10, [#allocation3]  }
   0x4   :  { %96 = dma.done.wait [#allocation3], 256  }
   0x5   :  { %97 = vsyncadd [#allocation3], 4294967040  ;;  %s101_s11 = smov [#allocation5]   ;;  %s36_s15 = sshll.u32 %s119_s1, 4  ;;  %v23_v0 = vld [vmem:[#allocation2] sm:$0xff]  ;;  %v24_v1 = vld [vmem:[#allocation2 + $0x8] sm:$0xff]  ;;  %s37_s15 = int_to_ptr.hbm [resolvable:$true] %s36_s15 }
   0x6   :  { %s34_s12 = sshll.u32 %s101_s11, 4  ;;  %v25_v2 = vmul.f32 2.0, %v23_v0  ;;  %v26_v3 = vmul.f32 2.0, %v24_v1  ;;  %s35_s12 = int_to_ptr.vmem [resolvable:$true] %s34_s12 }
   0x8   :  { %27 = vst [vmem:[#allocation5] sm:$0xff] %v25_v2 }
   0x9   :  { %28 = vst [vmem:[#allocation5 + $0x8] sm:$0xff] %v26_v3 }
   0xa   :  { %39 = dma.vmem_to_hbm [thread:$0]  %s35_s12, 256, %s37_s15, [#allocation4]  }
   0xb   :  { %98 = dma.done.wait [#allocation4], 256  }
   0xc   :  { %99 = vsyncadd [#allocation4], 4294967040 }
   0xd   :  { %44 = vsyncpa [#allocation3], 1 }
   0xe   :  { %45 = vsyncpa [#allocation4], 1 }

</bundles_post_ra>
